<compile_context>
chip_gen: v7x
topology: tpu7x:2x2x1
jax: 0.10.0
libtpu: 0.0.40
codegen_flags: <defaults>
</compile_context>

<pallas_src>
import jax
import jax.numpy as jnp
from jax.experimental import pallas as pl
from jax.experimental.pallas import tpu as pltpu

_EPS = 1e-5  # PyTorch InstanceNorm2d default (affine=False, biased variance)


def _round_up(x, m):
    return (x + m - 1) // m * m


def _make_fused_kernel(H, W):
    HW = H * W
    # Flat-index shift for tap (dh, dw); rolling by (-s) % HW brings
    # x[p + dh*W + dw] to lane p (invalid lanes are zeroed by the mask).
    shifts = tuple((-(dh * W + dw)) % HW for dh in (-1, 0, 1) for dw in (-1, 0, 1))

    def stage(x_f32, w_ref, mask_ref):
        # x_f32: (C, HW) f32, C multiple of 8.  w_ref: (C_out, 9*C) bf16.
        # mask_ref: (9*C, HW) f32 zero-padding mask.
        taps = [x_f32 if s == 0 else pltpu.roll(x_f32, s, axis=1) for s in shifts]
        xcol = jnp.concatenate(taps, axis=0) * mask_ref[...]        # (9*C, HW) f32
        acc = jnp.dot(w_ref[...], xcol.astype(jnp.bfloat16),
                      preferred_element_type=jnp.float32)           # (C_out, HW) f32
        # InstanceNorm2d (affine=False, biased variance): one pass over lanes.
        inv_hw = 1.0 / HW
        mean = jnp.sum(acc, axis=1, keepdims=True) * inv_hw
        ex2 = jnp.sum(acc * acc, axis=1, keepdims=True) * inv_hw
        var = jnp.maximum(ex2 - mean * mean, 0.0)
        y = (acc - mean) * jax.lax.rsqrt(var + _EPS)
        return jnp.maximum(y, 0.0)                                  # ReLU (f32)

    def kernel(x_ref, w1_ref, w2_ref, m1_ref, m2_ref, out_ref):
        x = x_ref[0].astype(jnp.float32)        # (C_in_p, HW)
        y1 = stage(x, w1_ref, m1_ref)           # (C_mid_p, HW) -- stays on-chip
        y2 = stage(y1, w2_ref, m2_ref)          # (C_out, HW)
        out_ref[0] = y2.astype(out_ref.dtype)

    return kernel


def _tap_masks(H, W, rows):
    """(9*rows, H*W) f32 mask: 1 where a 3x3 tap reads inside the image, 0 where it
    would read the zero padding (tap order matches the in-kernel concatenation)."""
    hh = jnp.arange(H)[:, None]
    ww = jnp.arange(W)[None, :]
    pieces = []
    for dh in (-1, 0, 1):
        for dw in (-1, 0, 1):
            ok = (hh + dh >= 0) & (hh + dh < H) & (ww + dw >= 0) & (ww + dw < W)
            pieces.append(jnp.broadcast_to(ok.reshape(1, H * W), (rows, H * W)))
    return jnp.concatenate(pieces, axis=0).astype(jnp.float32)


def _pack_weights(w, c_in_pad, c_out_pad):
    """(C_out, C_in, 3, 3) -> (c_out_pad, 9*c_in_pad) bf16, K laid out tap-major to
    match the in-kernel tap concatenation order."""
    c_out, c_in = w.shape[0], w.shape[1]
    wp = jnp.pad(w, ((0, c_out_pad - c_out), (0, c_in_pad - c_in), (0, 0), (0, 0)))
    wp = jnp.transpose(wp, (0, 2, 3, 1))               # (c_out_pad, 3, 3, c_in_pad)
    return wp.reshape(c_out_pad, 9 * c_in_pad).astype(jnp.bfloat16)


def conv3x3_forward(x_nchw, params):
    """Equivalent of Conv3x3.forward: (conv 3x3 s1 p1 -> IN -> ReLU) twice, fused."""
    N, C_in, H, W = x_nchw.shape
    C_out = params["w1"].shape[0]
    HW = H * W

    c_in_p = _round_up(C_in, 8)      # sublane-tile aligned channel counts
    c_mid_p = _round_up(C_out, 8)

    # Activations: channels on sublanes, flattened HW on lanes, bf16 for DMA/MXU.
    x_flat = x_nchw.reshape(N, C_in, HW)
    if c_in_p != C_in:
        x_flat = jnp.pad(x_flat, ((0, 0), (0, c_in_p - C_in), (0, 0)))
    x_flat = x_flat.astype(jnp.bfloat16)

    # NOTE: conv biases (params["b1"], params["b2"]) are intentionally unused:
    # InstanceNorm2d(affine=False) cancels a per-channel bias exactly.
    w1 = _pack_weights(params["w1"], c_in_p, c_mid_p)   # (c_mid_p, 9*c_in_p)
    w2 = _pack_weights(params["w2"], c_mid_p, C_out)    # (C_out,   9*c_mid_p)
    m1 = _tap_masks(H, W, c_in_p)                       # (9*c_in_p, HW)
    m2 = _tap_masks(H, W, c_mid_p)                      # (9*c_mid_p, HW)

    kernel = _make_fused_kernel(H, W)

    out = pl.pallas_call(
        kernel,
        out_shape=jax.ShapeDtypeStruct((N, C_out, HW), jnp.float32),
        grid_spec=pltpu.PrefetchScalarGridSpec(
            num_scalar_prefetch=0,
            grid=(N,),   # >=2-way parallel axis keeps both v7x TensorCores busy
            in_specs=[
                pl.BlockSpec((1, c_in_p, HW), lambda n: (n, 0, 0)),
                pl.BlockSpec((c_mid_p, 9 * c_in_p), lambda n: (0, 0)),
                pl.BlockSpec((C_out, 9 * c_mid_p), lambda n: (0, 0)),
                pl.BlockSpec((9 * c_in_p, HW), lambda n: (0, 0)),
                pl.BlockSpec((9 * c_mid_p, HW), lambda n: (0, 0)),
            ],
            out_specs=pl.BlockSpec((1, C_out, HW), lambda n: (n, 0, 0)),
        ),
        compiler_params=pltpu.CompilerParams(
            dimension_semantics=("parallel",),
        ),
    )(x_flat, w1, w2, m1, m2)

    # Output is already in flattened NCHW order: free reshape, no transpose.
    return out.reshape(N, C_out, H, W)


def init_conv3x3_params(key, in_feat, out_feat):
    """Deterministic init mimicking nn.Conv2d default (uniform +/-1/sqrt(fan_in))."""
    k1, k2, k3, k4 = jax.random.split(key, 4)
    fan1 = in_feat * 9
    fan2 = out_feat * 9
    b1lim = 1.0 / (fan1 ** 0.5)
    b2lim = 1.0 / (fan2 ** 0.5)
    return {
        "w1": jax.random.uniform(k1, (out_feat, in_feat, 3, 3), jnp.float32, -b1lim, b1lim),
        "b1": jax.random.uniform(k2, (out_feat,), jnp.float32, -b1lim, b1lim),
        "w2": jax.random.uniform(k3, (out_feat, out_feat, 3, 3), jnp.float32, -b2lim, b2lim),
        "b2": jax.random.uniform(k4, (out_feat,), jnp.float32, -b2lim, b2lim),
    }


def _ref_stage(x, w, b):
    y = jax.lax.conv_general_dilated(
        x, w, window_strides=(1, 1), padding=((1, 1), (1, 1)),
        dimension_numbers=("NCHW", "OIHW", "NCHW"),
    ) + b[None, :, None, None]
    mean = y.mean(axis=(2, 3), keepdims=True)
    var = jnp.square(y - mean).mean(axis=(2, 3), keepdims=True)
    y = (y - mean) * jax.lax.rsqrt(var + _EPS)
    return jnp.maximum(y, 0.0)


def _ref_forward(x, params):
    y = _ref_stage(x, params["w1"], params["b1"])
    return _ref_stage(y, params["w2"], params["b2"])


if __name__ == "__main__":
    key = jax.random.PRNGKey(0)
    pkey, xkey = jax.random.split(key)

    in_feat, out_feat = 4, 8
    N, H, W = 2, 16, 16

    params = init_conv3x3_params(pkey, in_feat, out_feat)
    x = jax.random.normal(xkey, (N, in_feat, H, W), jnp.float32)

    out = conv3x3_forward(x, params)
    out = jax.block_until_ready(out)

    assert out.shape == (N, out_feat, H, W), out.shape

    # Sanity-check against a plain-JAX f32 reference (loose tol: bf16 MXU operands).
    ref = jax.block_until_ready(_ref_forward(x, params))
    assert jnp.allclose(out, ref, atol=5e-2, rtol=5e-2), float(jnp.max(jnp.abs(out - ref)))

    print("KERNEL_OK")
</pallas_src>

<mosaic_0001>
module attributes {stable_mosaic.version = 11 : i64} {
  func.func @kernel(%arg0: i32, %arg1: memref<1x8x256xbf16, #tpu.memory_space<vmem>>, %arg2: memref<8x72xbf16, #tpu.memory_space<vmem>>, %arg3: memref<8x72xbf16, #tpu.memory_space<vmem>>, %arg4: memref<72x256xf32, #tpu.memory_space<vmem>>, %arg5: memref<72x256xf32, #tpu.memory_space<vmem>>, %arg6: memref<1x8x256xf32, #tpu.memory_space<vmem>>) attributes {dimension_semantics = [#tpu.dimension_semantics<parallel>], iteration_bounds = array<i64: 2>, scalar_prefetch = 0 : i64, scratch_operands = 0 : i64, tpu.core_type = #tpu.core_type<tc>, window_params = [{transform_indices = @transform_0, window_bounds = array<i64: 1, 8, 256>}, {pipeline_mode = #tpu.pipeline_mode<synchronous>, transform_indices = @transform_1, window_bounds = array<i64: 8, 72>}, {pipeline_mode = #tpu.pipeline_mode<synchronous>, transform_indices = @transform_2, window_bounds = array<i64: 8, 72>}, {pipeline_mode = #tpu.pipeline_mode<synchronous>, transform_indices = @transform_3, window_bounds = array<i64: 72, 256>}, {pipeline_mode = #tpu.pipeline_mode<synchronous>, transform_indices = @transform_4, window_bounds = array<i64: 72, 256>}, {transform_indices = @transform_5, window_bounds = array<i64: 1, 8, 256>}]} {
    %c0 = arith.constant 0 : index
    %c0_0 = arith.constant 0 : index
    %c0_1 = arith.constant 0 : index
    %0 = vector.load %arg1[%c0, %c0_0, %c0_1] : memref<1x8x256xbf16, #tpu.memory_space<vmem>>, vector<1x8x256xbf16>
    %1 = vector.shape_cast %0 : vector<1x8x256xbf16> to vector<8x256xbf16>
    %2 = arith.extf %1 : vector<8x256xbf16> to vector<8x256xf32>
    %c17_i32 = arith.constant 17 : i32
    %3 = tpu.dynamic_rotate %2 by %c17_i32 dim 1 : vector<8x256xf32>, i32 -> vector<8x256xf32>
    %c16_i32 = arith.constant 16 : i32
    %4 = tpu.dynamic_rotate %2 by %c16_i32 dim 1 : vector<8x256xf32>, i32 -> vector<8x256xf32>
    %c15_i32 = arith.constant 15 : i32
    %5 = tpu.dynamic_rotate %2 by %c15_i32 dim 1 : vector<8x256xf32>, i32 -> vector<8x256xf32>
    %c1_i32 = arith.constant 1 : i32
    %6 = tpu.dynamic_rotate %2 by %c1_i32 dim 1 : vector<8x256xf32>, i32 -> vector<8x256xf32>
    %c255_i32 = arith.constant 255 : i32
    %7 = tpu.dynamic_rotate %2 by %c255_i32 dim 1 : vector<8x256xf32>, i32 -> vector<8x256xf32>
    %c241_i32 = arith.constant 241 : i32
    %8 = tpu.dynamic_rotate %2 by %c241_i32 dim 1 : vector<8x256xf32>, i32 -> vector<8x256xf32>
    %c240_i32 = arith.constant 240 : i32
    %9 = tpu.dynamic_rotate %2 by %c240_i32 dim 1 : vector<8x256xf32>, i32 -> vector<8x256xf32>
    %c239_i32 = arith.constant 239 : i32
    %10 = tpu.dynamic_rotate %2 by %c239_i32 dim 1 : vector<8x256xf32>, i32 -> vector<8x256xf32>
    %11 = tpu.concatenate %3, %4, %5, %6, %2, %7, %8, %9, %10 in 0 : vector<8x256xf32>, vector<8x256xf32>, vector<8x256xf32>, vector<8x256xf32>, vector<8x256xf32>, vector<8x256xf32>, vector<8x256xf32>, vector<8x256xf32>, vector<8x256xf32> -> vector<72x256xf32>
    %c0_2 = arith.constant 0 : index
    %c0_3 = arith.constant 0 : index
    %12 = vector.load %arg4[%c0_2, %c0_3] : memref<72x256xf32, #tpu.memory_space<vmem>>, vector<72x256xf32>
    %13 = arith.mulf %11, %12 : vector<72x256xf32>
    %c0_4 = arith.constant 0 : index
    %c0_5 = arith.constant 0 : index
    %14 = vector.load %arg2[%c0_4, %c0_5] : memref<8x72xbf16, #tpu.memory_space<vmem>>, vector<8x72xbf16>
    %15 = arith.truncf %13 : vector<72x256xf32> to vector<72x256xbf16>
    %cst = arith.constant dense<0.000000e+00> : vector<8x256xf32>
    %16 = tpu.matmul %14, %15, %cst {dimension_numbers = #tpu.dot_dimension_numbers<[1], [0], [0], [1], [0, 0, 1, 1], [], []>} : vector<8x72xbf16>, vector<72x256xbf16>, vector<8x256xf32> -> vector<8x256xf32>
    %cst_6 = arith.constant dense<0.000000e+00> : vector<8xf32>
    %17 = vector.multi_reduction <add>, %16, %cst_6 [1] : vector<8x256xf32> to vector<8xf32>
    %18 = vector.shape_cast %17 : vector<8xf32> to vector<8x1xf32>
    %cst_7 = arith.constant 3.906250e-03 : f32
    %19 = vector.broadcast %cst_7 : f32 to vector<8x1xf32>
    %20 = arith.mulf %18, %19 : vector<8x1xf32>
    %21 = arith.mulf %16, %16 : vector<8x256xf32>
    %cst_8 = arith.constant dense<0.000000e+00> : vector<8xf32>
    %22 = vector.multi_reduction <add>, %21, %cst_8 [1] : vector<8x256xf32> to vector<8xf32>
    %23 = vector.shape_cast %22 : vector<8xf32> to vector<8x1xf32>
    %cst_9 = arith.constant 3.906250e-03 : f32
    %24 = vector.broadcast %cst_9 : f32 to vector<8x1xf32>
    %25 = arith.mulf %23, %24 : vector<8x1xf32>
    %26 = arith.mulf %20, %20 : vector<8x1xf32>
    %27 = arith.subf %25, %26 : vector<8x1xf32>
    %cst_10 = arith.constant 0.000000e+00 : f32
    %28 = vector.broadcast %cst_10 : f32 to vector<8x1xf32>
    %29 = arith.maximumf %27, %28 : vector<8x1xf32>
    %30 = vector.broadcast %20 : vector<8x1xf32> to vector<8x256xf32>
    %31 = arith.subf %16, %30 : vector<8x256xf32>
    %cst_11 = arith.constant 9.99999974E-6 : f32
    %32 = vector.broadcast %cst_11 : f32 to vector<8x1xf32>
    %33 = arith.addf %29, %32 : vector<8x1xf32>
    %34 = math.rsqrt %33 : vector<8x1xf32>
    %35 = vector.broadcast %34 : vector<8x1xf32> to vector<8x256xf32>
    %36 = arith.mulf %31, %35 : vector<8x256xf32>
    %cst_12 = arith.constant 0.000000e+00 : f32
    %37 = vector.broadcast %cst_12 : f32 to vector<8x256xf32>
    %38 = arith.maximumf %36, %37 : vector<8x256xf32>
    %c17_i32_13 = arith.constant 17 : i32
    %39 = tpu.dynamic_rotate %38 by %c17_i32_13 dim 1 : vector<8x256xf32>, i32 -> vector<8x256xf32>
    %c16_i32_14 = arith.constant 16 : i32
    %40 = tpu.dynamic_rotate %38 by %c16_i32_14 dim 1 : vector<8x256xf32>, i32 -> vector<8x256xf32>
    %c15_i32_15 = arith.constant 15 : i32
    %41 = tpu.dynamic_rotate %38 by %c15_i32_15 dim 1 : vector<8x256xf32>, i32 -> vector<8x256xf32>
    %c1_i32_16 = arith.constant 1 : i32
    %42 = tpu.dynamic_rotate %38 by %c1_i32_16 dim 1 : vector<8x256xf32>, i32 -> vector<8x256xf32>
    %c255_i32_17 = arith.constant 255 : i32
    %43 = tpu.dynamic_rotate %38 by %c255_i32_17 dim 1 : vector<8x256xf32>, i32 -> vector<8x256xf32>
    %c241_i32_18 = arith.constant 241 : i32
    %44 = tpu.dynamic_rotate %38 by %c241_i32_18 dim 1 : vector<8x256xf32>, i32 -> vector<8x256xf32>
    %c240_i32_19 = arith.constant 240 : i32
    %45 = tpu.dynamic_rotate %38 by %c240_i32_19 dim 1 : vector<8x256xf32>, i32 -> vector<8x256xf32>
    %c239_i32_20 = arith.constant 239 : i32
    %46 = tpu.dynamic_rotate %38 by %c239_i32_20 dim 1 : vector<8x256xf32>, i32 -> vector<8x256xf32>
    %47 = tpu.concatenate %39, %40, %41, %42, %38, %43, %44, %45, %46 in 0 : vector<8x256xf32>, vector<8x256xf32>, vector<8x256xf32>, vector<8x256xf32>, vector<8x256xf32>, vector<8x256xf32>, vector<8x256xf32>, vector<8x256xf32>, vector<8x256xf32> -> vector<72x256xf32>
    %c0_21 = arith.constant 0 : index
    %c0_22 = arith.constant 0 : index
    %48 = vector.load %arg5[%c0_21, %c0_22] : memref<72x256xf32, #tpu.memory_space<vmem>>, vector<72x256xf32>
    %49 = arith.mulf %47, %48 : vector<72x256xf32>
    %c0_23 = arith.constant 0 : index
    %c0_24 = arith.constant 0 : index
    %50 = vector.load %arg3[%c0_23, %c0_24] : memref<8x72xbf16, #tpu.memory_space<vmem>>, vector<8x72xbf16>
    %51 = arith.truncf %49 : vector<72x256xf32> to vector<72x256xbf16>
    %cst_25 = arith.constant dense<0.000000e+00> : vector<8x256xf32>
    %52 = tpu.matmul %50, %51, %cst_25 {dimension_numbers = #tpu.dot_dimension_numbers<[1], [0], [0], [1], [0, 0, 1, 1], [], []>} : vector<8x72xbf16>, vector<72x256xbf16>, vector<8x256xf32> -> vector<8x256xf32>
    %cst_26 = arith.constant dense<0.000000e+00> : vector<8xf32>
    %53 = vector.multi_reduction <add>, %52, %cst_26 [1] : vector<8x256xf32> to vector<8xf32>
    %54 = vector.shape_cast %53 : vector<8xf32> to vector<8x1xf32>
    %cst_27 = arith.constant 3.906250e-03 : f32
    %55 = vector.broadcast %cst_27 : f32 to vector<8x1xf32>
    %56 = arith.mulf %54, %55 : vector<8x1xf32>
    %57 = arith.mulf %52, %52 : vector<8x256xf32>
    %cst_28 = arith.constant dense<0.000000e+00> : vector<8xf32>
    %58 = vector.multi_reduction <add>, %57, %cst_28 [1] : vector<8x256xf32> to vector<8xf32>
    %59 = vector.shape_cast %58 : vector<8xf32> to vector<8x1xf32>
    %cst_29 = arith.constant 3.906250e-03 : f32
    %60 = vector.broadcast %cst_29 : f32 to vector<8x1xf32>
    %61 = arith.mulf %59, %60 : vector<8x1xf32>
    %62 = arith.mulf %56, %56 : vector<8x1xf32>
    %63 = arith.subf %61, %62 : vector<8x1xf32>
    %cst_30 = arith.constant 0.000000e+00 : f32
    %64 = vector.broadcast %cst_30 : f32 to vector<8x1xf32>
    %65 = arith.maximumf %63, %64 : vector<8x1xf32>
    %66 = vector.broadcast %56 : vector<8x1xf32> to vector<8x256xf32>
    %67 = arith.subf %52, %66 : vector<8x256xf32>
    %cst_31 = arith.constant 9.99999974E-6 : f32
    %68 = vector.broadcast %cst_31 : f32 to vector<8x1xf32>
    %69 = arith.addf %65, %68 : vector<8x1xf32>
    %70 = math.rsqrt %69 : vector<8x1xf32>
    %71 = vector.broadcast %70 : vector<8x1xf32> to vector<8x256xf32>
    %72 = arith.mulf %67, %71 : vector<8x256xf32>
    %cst_32 = arith.constant 0.000000e+00 : f32
    %73 = vector.broadcast %cst_32 : f32 to vector<8x256xf32>
    %74 = arith.maximumf %72, %73 : vector<8x256xf32>
    %c0_33 = arith.constant 0 : index
    %c0_34 = arith.constant 0 : index
    %c0_35 = arith.constant 0 : index
    %75 = vector.load %arg6[%c0_33, %c0_34, %c0_35] : memref<1x8x256xf32, #tpu.memory_space<vmem>>, vector<1x8x256xf32>
    %76 = vector.shape_cast %75 : vector<1x8x256xf32> to vector<8x256xf32>
    %77 = vector.shape_cast %74 : vector<8x256xf32> to vector<1x8x256xf32>
    tpu.vector_store %arg6[%c0_33, %c0_34, %c0_35], %77 {strides = array<i32>} : memref<1x8x256xf32, #tpu.memory_space<vmem>>, vector<1x8x256xf32>,
    return
  }
  func.func @transform_0(%arg0: i32) -> (i32, i32, i32) {
    %c0_i32 = arith.constant 0 : i32
    %c0_i32_0 = arith.constant 0 : i32
    %c0_i32_1 = arith.constant 0 : i32
    return %arg0, %c0_i32, %c0_i32_0 : i32, i32, i32
  }
  func.func @transform_1(%arg0: i32) -> (i32, i32) {
    %c0_i32 = arith.constant 0 : i32
    %c0_i32_0 = arith.constant 0 : i32
    %c0_i32_1 = arith.constant 0 : i32
    return %c0_i32, %c0_i32_0 : i32, i32
  }
  func.func @transform_2(%arg0: i32) -> (i32, i32) {
    %c0_i32 = arith.constant 0 : i32
    %c0_i32_0 = arith.constant 0 : i32
    %c0_i32_1 = arith.constant 0 : i32
    return %c0_i32, %c0_i32_0 : i32, i32
  }
  func.func @transform_3(%arg0: i32) -> (i32, i32) {
    %c0_i32 = arith.constant 0 : i32
    %c0_i32_0 = arith.constant 0 : i32
    %c0_i32_1 = arith.constant 0 : i32
    return %c0_i32, %c0_i32_0 : i32, i32
  }
  func.func @transform_4(%arg0: i32) -> (i32, i32) {
    %c0_i32 = arith.constant 0 : i32
    %c0_i32_0 = arith.constant 0 : i32
    %c0_i32_1 = arith.constant 0 : i32
    return %c0_i32, %c0_i32_0 : i32, i32
  }
  func.func @transform_5(%arg0: i32) -> (i32, i32, i32) {
    %c0_i32 = arith.constant 0 : i32
    %c0_i32_0 = arith.constant 0 : i32
    %c0_i32_1 = arith.constant 0 : i32
    return %arg0, %c0_i32, %c0_i32_0 : i32, i32, i32
  }
}

</mosaic_0001>

<bundles_post_ra>
// kernel: tpu_custom_call.1
= control target key start
LH: loop header
LB: loop body
LE: loop exit
PB: predicated region body
PF: predicated region fallthrough
CT: control target
= control target key end

     0   :  { %10 = vsyncpa [#allocation3], 0  ;;  %s1526_s0 = inlined_call_operand.hbm [shape: bf16[2,8,256], index: 0, kind: input, shape index: {}]   ;;  %s1527_s1 = inlined_call_operand.hbm [shape: bf16[8,72], index: 1, kind: input, shape index: {}]   ;;  %s1528_s2 = inlined_call_operand.vmem [shape: bf16[8,72], index: 2, kind: input, shape index: {}]   ;;  %s1529_s3 = inlined_call_operand.hbm [shape: f32[72,256], index: 3, kind: input, shape index: {}]   ;;  %s1530_s4 = inlined_call_operand.hbm [shape: f32[72,256], index: 4, kind: input, shape index: {}]   ;;  %s1531_s5 = inlined_call_operand.hbm [shape: f32[2,8,256], index: 5, kind: output, shape index: {}]  }
   0x1   :  { %12 = vsyncpa [#allocation3 + $0x1], 0 }
   0x2   :  { %13 = vsyncpa [#allocation6], 0 }
   0x3   :  { %14 = vsyncpa [#allocation9], 0 }
   0x4   :  { %15 = vsyncpa [#allocation4], 0 }
   0x5   :  { %17 = vsyncpa [#allocation4 + $0x1], 0  ;;  %s1141_s18 = smov 0   ;;  %s1143_s19 = smov 0  }
   0x6   :  { %s1145_s20 = smov 0   ;;  %s1147_s21 = smov 0  }
   0x7 LB: > { %s1162_s22 = sadd.s32 4294967295, %s1093_s21   ;;  %s747_s23 = sadd.s32 4294967294, %s1093_s21   ;;  %s1093_s21 = sphi %s1147_s21, %s1554_s21   ;;  %s1089_s20 = sphi %s1145_s20, %s1553_s20   ;;  %s1085_s19 = sphi %s1143_s19, %s1552_s19   ;;  %s1081_s18 = sphi %s1141_s18, %s1551_s18  }
   0x8   : > { %p43_p0 = scmp.ne.s32.totalorder %s1085_s19, %s1081_s18  ;;  %p1532_p1 = scmp.eq.s32.totalorder %s1162_s22, 0 }
   0x9   : > { %p157_p3 = scmp.eq.s32.totalorder %s747_s23, 1  ;;  %p748_p5 = scmp.ge.s32.totalorder %s1093_s21, 1 }
   0xa   : > { %p1171_p4 = por %p1532_p1, %p43_p0  ;;  %p164_p7 = scmp.lt.s32.totalorder %s1093_s21, 3 }
   0xb   : > { %p1176_p6 = por %p157_p3, %p43_p0  ;;  %s1095_s27 = smov [#allocation5]  }
   0xc   : > { %s1535_s24 = scalar_select %p1171_p4, 1, 0 }
   0xd   : > { %s1536_s25 = scalar_select %p1176_p6, 1, 0 }
   0xe   : > { %p1181_p8 = pnand %p748_p5, %p164_p7  ;;  %s177_s28 = sshll.u32 %s1095_s27, 4  ;;  %s178_s28 = int_to_ptr.vmem [resolvable:$true] %s177_s28 }
   0xf   : > { %s1096_s29 = smov [#allocation7]   ;;  %s1097_s7 = smov [#allocation8]  }
  0x10   : > { %s1537_s26 = scalar_select %p1181_p8, 1, 0 }
  0x11   : > { %p789_p10 = pneg %p1181_p8  ;;  %s190_s30 = sshll.u32 %s1096_s29, 4  ;;  %s1194_s30 = int_to_ptr.vmem [resolvable:$true] %s190_s30 }
  0x12   : > { %s1196_s8 = sshll.u32 %s1097_s7, 4  ;;  %s905_s11 = scalar_lea.hbm %s1527_s1, 64  ;;  %s204_s8 = int_to_ptr.vmem [resolvable:$true] %s1196_s8 }
  0x13   : > { %p1190_p11 = pnand %p789_p10, %p1532_p1  ;;  %p906_p12 = scmp.ne.s32.totalorder %s1527_s1, %s905_s11 }
  0x14   : > { %p912_p5 = scmp.lt.u32.totalorder %s905_s11, %s1527_s1 }
  0x15   : > { %p1206_p13 = pneg %p1190_p11 }
  0x17   : > { %p908_p0 = pnand %p1206_p13, %p906_p12 }
  0x19   : > { %p909_p3 = pneg %p908_p0 }
  0x1b   : > { %p914_p7 = pnand %p912_p5, %p909_p3 }
  0x1d   : > { %917 = shalt.err (!%p914_p7)
}
  0x1e   : > { %s918_s17 = scalar_lea.vmem %s178_s28, 64  ;;  %p926_p2 = scmp.lt.s32.totalorder %s178_s28, %s178_s28 }
  0x1f   : > { %p919_p10 = scmp.ne.s32.totalorder %s178_s28, %s918_s17  ;;  %p927_p6 = scmp.lt.s32.totalorder %s918_s17, %s918_s17 }
  0x21   : > { %p921_p9 = pnand %p919_p10, %p1206_p13  ;;  %p928_p4 = por %p927_p6, %p926_p2 }
  0x23   : > { %p922_p1 = pneg %p921_p9 }
  0x25   : > { %p929_p8 = pnand %p928_p4, %p922_p1 }
  0x27   : > { %932 = shalt.err (!%p929_p8)
}
  0x28   : > { %792 = dma.hbm_to_vmem [thread:$0]  (!%p1190_p11), %s1527_s1, 64, %s178_s28, [#allocation6]  }
  0x29   : > { %s933_s9 = scalar_lea.hbm %s1529_s3, 2304 }
  0x2a   : > { %p934_p9 = scmp.ne.s32.totalorder %s1529_s3, %s933_s9  ;;  %p940_p1 = scmp.lt.u32.totalorder %s933_s9, %s1529_s3 }
  0x2c   : > { %p936_p12 = pnand %p934_p9, %p1206_p13 }
  0x2e   : > { %p937_p2 = pneg %p936_p12 }
  0x30   : > { %p942_p4 = pnand %p940_p1, %p937_p2 }
  0x32   : > { %945 = shalt.err (!%p942_p4)
}
  0x33   : > { %s946_s28 = scalar_lea.vmem %s1194_s30, 2304  ;;  %p954_p3 = scmp.lt.s32.totalorder %s1194_s30, %s1194_s30 }
  0x34   : > { %p947_p6 = scmp.ne.s32.totalorder %s1194_s30, %s946_s28  ;;  %p955_p5 = scmp.lt.s32.totalorder %s946_s28, %s946_s28 }
  0x36   : > { %p949_p8 = pnand %p947_p6, %p1206_p13  ;;  %p956_p7 = por %p955_p5, %p954_p3 }
  0x38   : > { %p950_p0 = pneg %p949_p8 }
  0x3a   : > { %p957_p10 = pnand %p956_p7, %p950_p0 }
  0x3c   : > { %960 = shalt.err (!%p957_p10)
}
  0x3d   : > { %s1098_s15 = smov 256   ;;  %s1099_s16 = smov 16  }
  0x3e   : > { %795 = dma.hbm_to_vmem [thread:$0]  (!%p1190_p11), %s1529_s3, 2304, %s1194_s30, [#allocation6], %s1098_s15, %s1098_s15, %s1099_s16  }
  0x3f   : > { %s961_s7 = scalar_lea.hbm %s1530_s4, 2304 }
  0x40   : > { %p962_p9 = scmp.ne.s32.totalorder %s1530_s4, %s961_s7  ;;  %p968_p1 = scmp.lt.u32.totalorder %s961_s7, %s1530_s4 }
  0x42   : > { %p964_p12 = pnand %p962_p9, %p1206_p13 }
  0x44   : > { %p965_p2 = pneg %p964_p12 }
  0x46   : > { %p970_p4 = pnand %p968_p1, %p965_p2 }
  0x48   : > { %973 = shalt.err (!%p970_p4)
}
  0x49   : > { %s974_s13 = scalar_lea.vmem %s204_s8, 2304  ;;  %p982_p3 = scmp.lt.s32.totalorder %s204_s8, %s204_s8 }
  0x4a   : > { %p975_p6 = scmp.ne.s32.totalorder %s204_s8, %s974_s13  ;;  %p983_p5 = scmp.lt.s32.totalorder %s974_s13, %s974_s13 }
  0x4c   : > { %p977_p8 = pnand %p975_p6, %p1206_p13  ;;  %p984_p7 = por %p983_p5, %p982_p3 }
  0x4e   : > { %p978_p0 = pneg %p977_p8 }
  0x50   : > { %p985_p10 = pnand %p984_p7, %p978_p0 }
  0x52   : > { %988 = shalt.err (!%p985_p10)
}
  0x53   : > { %798 = dma.hbm_to_vmem [thread:$0]  (!%p1190_p11), %s1530_s4, 2304, %s204_s8, [#allocation9], %s1098_s15, %s1098_s15, %s1099_s16  }
  0x54   : > { %s1265_s14 = sadd.s32 1, %s1093_s21   ;;  %s30_s6 = sadd.s32 1, %s1089_s20 }
  0x55   : > { %s27_s17 = ssub.s32 %s1093_s21, %s1265_s14  ;;  %p37_p9 = scmp.ne.s32.totalorder %s1089_s20, %s1085_s19 }
  0x56   : > { %p28_p13 = scmp.eq.s32.totalorder %s27_s17, 0  ;;  %p38_p12 = scmp.eq.s32.totalorder %s1093_s21, 0 }
  0x57   : > { %p810_p2 = scmp.lt.s32.totalorder %s1093_s21, 2  ;;  %p1540_p4 = scmp.eq.s32.totalorder %s1162_s22, 1 }
  0x58   : > { %s1275_s23 = scalar_select %p28_p13, %s1089_s20, %s30_s6  }
  0x59   : > { %p39_p1 = por %p38_p12, %p37_p9  ;;  %p1279_p6 = por %p1540_p4, %p37_p9 }
  0x5a   : > { %s217_s29 = sand.u32 1, %s1089_s20   ;;  %s771_s7 = sshll.u32 %s1093_s21, 7 }
  0x5b   : > { %s753_s8 = sshll.u32 %s217_s29, 3  ;;  %s1288_s9 = scalar_lea.hbm %s1526_s0, %s771_s7 }
  0x5c   : > { %s221_s10 = scalar_lea.vmem [#allocation2], %s753_s8  ;;  %p1290_p11 = pnand %p810_p2, %p39_p1 }
  0x5d   : > { %s229_s11 = sshll.u32 %s221_s10, 4  ;;  %s218_s13 = scalar_lea.sflag [#allocation3], %s217_s29  ;;  %s1294_s11 = int_to_ptr.vmem [resolvable:$true] %s229_s11 }
  0x5e   : > { %s989_s30 = scalar_lea.hbm %s1288_s9, 128  ;;  %p991_p0 = pneg %p1290_p11 }
  0x5f   : > { %p990_p8 = scmp.ne.s32.totalorder %s1288_s9, %s989_s30  ;;  %s994_s6 = scalar_lea.hbm %s1526_s0, 256 }
  0x60   : > { %p995_p7 = scmp.lt.u32.totalorder %s1288_s9, %s1526_s0  ;;  %p996_p10 = scmp.lt.u32.totalorder %s994_s6, %s989_s30 }
  0x61   : > { %p992_p3 = pnand %p991_p0, %p990_p8  ;;  %p998_p9 = scmp.lt.u32.totalorder %s989_s30, %s1288_s9 }
  0x62   : > { %p997_p13 = por %p996_p10, %p995_p7 }
  0x63   : > { %p993_p5 = pneg %p992_p3 }
  0x64   : > { %p999_p12 = por %p998_p9, %p997_p13 }
  0x66   : > { %p1000_p2 = pnand %p999_p12, %p993_p5 }
  0x68   : > { %1003 = shalt.err (!%p1000_p2)
}
  0x69   : > { %s1004_s29 = scalar_lea.vmem %s1294_s11, 128  ;;  %s1100_s15 = smov [#allocation2]  }
  0x6a   : > { %p1005_p1 = scmp.ne.s32.totalorder %s1294_s11, %s1004_s29  ;;  %s1009_s16 = sshll.u32 %s1100_s15, 4  ;;  %s1010_s16 = int_to_ptr.vmem [resolvable:$false] %s1009_s16 }
  0x6b   : > { %s1011_s10 = scalar_lea.vmem %s1010_s16, 256  ;;  %p1012_p3 = scmp.lt.s32.totalorder %s1294_s11, %s1010_s16 }
  0x6c   : > { %p1007_p4 = pnand %p1005_p1, %p991_p0  ;;  %p1013_p7 = scmp.lt.s32.totalorder %s1011_s10, %s1004_s29 }
  0x6e   : > { %p1008_p8 = pneg %p1007_p4  ;;  %p1014_p10 = por %p1013_p7, %p1012_p3 }
  0x70   : > { %p1015_p13 = pnand %p1014_p10, %p1008_p8 }
  0x72   : > { %1018 = shalt.err (!%p1015_p13)
}
  0x73   : > { %802 = dma.hbm_to_vmem [thread:$0]  (!%p1290_p11), %s1288_s9, 128, %s1294_s11, %s218_s13  }
  0x74   : > { %p1543_p5 = scmp.ne.s32.totalorder %s1537_s26, 0 }
  0x75   : > { %s1324_s30 = sand.u32 (!%p1543_p5), 1, %s1085_s19   ;;  %p1544_p0 = scmp.ne.s32.totalorder (!%p1543_p5), %s1535_s24, 0 }
  0x76   : > { %238 = sbr.rel (%p1543_p5) target bundleno = 1213 (0x4bd), region = 40  ;;  %s757_s28 = sshll.u32 (!%p1543_p5), %s1324_s30, 3 }
  0x77   : > { %s241_s17 = scalar_lea.sflag (!%p1543_p5), [#allocation3], %s1324_s30  ;;  %s244_s6 = scalar_lea.vmem (!%p1543_p5), [#allocation2], %s757_s28 }
  0x7d   : > { %1064 = dma.done.wait (%p1544_p0), %s241_s17, 128  }
  0x7e   : > { %1066 = vsyncadd (%p1544_p0), %s241_s17, 4294967168  ;;  %p1545_p9 = scmp.eq.s32.totalorder %s1162_s22, 0 }
  0x80   : > { %1068 = dma.done.wait (%p1545_p9), [#allocation6], 2368   ;;  %p1546_p11 = pmov %p1545_p9 }
  0x81   : > { %p1547_p12 = pmov %p1545_p9 }
  0x82   : > { %1070 = vsyncadd (%p1546_p11), [#allocation6], 4294964928 }
  0x83   : > { %1072 = dma.done.wait (%p1547_p12), [#allocation9], 2304   ;;  %p1548_p2 = pmov %p1545_p9 }
  0x84   : > { %v1340_v0 = vld [vmem:[%s244_s6] sm:$0xff]  ;;  %s1101_s24 = smov 15   ;;  %s1102_s26 = smov 17   ;;  %v1109_v4 = vmov 0   ;;  %v291_v5 = vlaneseq  ;;  %v345_v16 = vld [vmem:[#allocation7] sm:$0xff]  ;;  %vm396_vm8 = vcmask 1043456  }
  0x85   : > { %1074 = vsyncadd (%p1548_p2), [#allocation9], 4294964992  ;;  %v285_v1 = vunpack.c.l.bf16 %v1340_v0  ;;  %v286_v2 = vunpack.c.h.bf16 %v1340_v0  ;;  %s1103_s9 = smov 1   ;;  %s1104_s11 = smov 16   ;;  %435 = vmatprep.mubr.bf16.mxu0 %v1109_v4  ;;  %601 = vmatprep.mubr.bf16.mxu1 %v1109_v4  ;;  %v346_v14 = vld [vmem:[#allocation7 + $0x8] sm:$0xff]  ;;  %v348_v21 = vld [vmem:[#allocation7 + $0x18] sm:$0xff] }
  0x86   : > { %s1105_s12 = smov 127   ;;  %s1106_s13 = smov 113   ;;  %v1354_v6 = vand.u32 127, %v291_v5  ;;  %v354_v17 = vld [vmem:[#allocation7 + $0x48] sm:$0xff]  ;;  %v347_v26 = vld [vmem:[#allocation7 + $0x10] sm:$0xff]  ;;  %v352_v28 = vld [vmem:[#allocation7 + $0x38] sm:$0xff] }
  0x87   : > { %v871_v3 = vpack.i.bf16 %v286_v2, %v285_v1  ;;  %s1107_s7 = smov 112   ;;  %s1108_s8 = smov 111   ;;  %v350_v27 = vld [vmem:[#allocation7 + $0x28] sm:$0xff]  ;;  %v372_v32 = vmul.f32 %v354_v17, %v286_v2  ;;  %v349_v37 = vld [vmem:[#allocation7 + $0x20] sm:$0xff]  ;;  %v351_v38 = vld [vmem:[#allocation7 + $0x30] sm:$0xff]  ;;  %vm392_vm9 = vcmask 588800  }
  0x88   : > { %vm307_vm0 = vcmp.lt.s32.totalorder %v1354_v6, 15  ;;  %vm293_vm1 = vcmp.lt.s32.totalorder %v1354_v6, 17  ;;  %vm314_vm2 = vcmp.lt.s32.totalorder %v1354_v6, 1  ;;  %vm300_vm3 = vcmp.lt.s32.totalorder %v1354_v6, 16  ;;  %v353_v45 = vld [vmem:[#allocation7 + $0x40] sm:$0xff]  ;;  %v356_v50 = vld [vmem:[#allocation7 + $0x58] sm:$0xff] }
  0x89   : > { %872 = vrot.lane.b32.xlu1 %v871_v3, %s1101_s24  ;;  %862 = vrot.lane.b32.xlu0 %v871_v3, %s1102_s26  ;;  %vm321_vm4 = vcmp.lt.s32.totalorder %v1354_v6, 127  ;;  %vm328_vm5 = vcmp.lt.s32.totalorder %v1354_v6, 113  ;;  %vm335_vm6 = vcmp.lt.s32.totalorder %v1354_v6, 112  ;;  %v355_v51 = vld [vmem:[#allocation7 + $0x50] sm:$0xff]  ;;  %v371_v59 = vmul.f32 %v353_v45, %v285_v1  ;;  %v358_v60 = vld [vmem:[#allocation7 + $0x68] sm:$0xff]  ;;  %s761_s16 = sshll.u32 %s1324_s30, 4 }
  0x8a   : > { %vm342_vm7 = vcmp.lt.s32.totalorder %v1354_v6, 111  ;;  %s772_s10 = sshll.u32 %s1162_s22, 8  ;;  %s282_s28 = scalar_lea.vmem [#allocation10], %s761_s16 }
  0x8b   : > { %s648_s17 = sshll.u32 %s282_s28, 4  ;;  %s1484_s17 = int_to_ptr.vmem [resolvable:$true] %s648_s17 }
  0x8c   : > { %s1019_s22 = scalar_lea.vmem %s1484_s17, 256 }
  0x8d   : > { %877 = vrot.lane.b32.xlu1 %v871_v3, %s1103_s9  ;;  %867 = vrot.lane.b32.xlu0 %v871_v3, %s1104_s11  ;;  %p1020_p1 = scmp.ne.s32.totalorder %s1484_s17, %s1019_s22 }
  0x8f   : > { %p1021_p4 = pnand %p1020_p1, %p1279_p6 }
  0x91   : > { %882 = vrot.lane.b32.xlu0 %v871_v3, %s1105_s12  ;;  %887 = vrot.lane.b32.xlu1 %v871_v3, %s1106_s13  ;;  %p1022_p8 = pneg %p1021_p4 }
  0x95   : > { %892 = vrot.lane.b32.xlu0 %v871_v3, %s1107_s7  ;;  %897 = vrot.lane.b32.xlu1 %v871_v3, %s1108_s8 }
  0xfb   : > { %v873_v7 = vpop.permute.xlu1 %872  ;;  %v863_v8 = vpop.permute.xlu0 %862 }
  0xfc   : > { %v875_v9 = vunpack.i.h.bf16 %v873_v7  ;;  %v874_v10 = vunpack.i.l.bf16 %v873_v7  ;;  %v865_v11 = vunpack.i.h.bf16 %v863_v8  ;;  %v864_v12 = vunpack.i.l.bf16 %v863_v8 }
  0xfe   : > { %v294_v13 = vsel %vm293_vm1, %v864_v12, %v865_v11  ;;  %v295_v15 = vsel %vm293_vm1, %v865_v11, %v864_v12  ;;  %v308_v18 = vsel %vm307_vm0, %v874_v10, %v875_v9  ;;  %v309_v29 = vsel %vm307_vm0, %v875_v9, %v874_v10  ;;  %v360_v9 = vld [vmem:[#allocation7 + $0x78] sm:$0xff]  ;;  %v357_v12 = vld [vmem:[#allocation7 + $0x60] sm:$0xff] }
  0xff   : > { %v878_v19 = vpop.permute.xlu1 %877  ;;  %v868_v20 = vpop.permute.xlu0 %867  ;;  %v364_v30 = vmul.f32 %v346_v14, %v294_v13  ;;  %v363_v31 = vmul.f32 %v345_v16, %v295_v15  ;;  %v368_v42 = vmul.f32 %v350_v27, %v308_v18  ;;  %v367_v54 = vmul.f32 %v349_v37, %v309_v29  ;;  %v359_v13 = vld [vmem:[#allocation7 + $0x70] sm:$0xff]  ;;  %v362_v16 = vld [vmem:[#allocation7 + $0x88] sm:$0xff] }
 0x100   : > { %v880_v22 = vunpack.i.h.bf16 %v878_v19  ;;  %v879_v23 = vunpack.i.l.bf16 %v878_v19  ;;  %v870_v24 = vunpack.i.h.bf16 %v868_v20  ;;  %v869_v25 = vunpack.i.l.bf16 %v868_v20  ;;  %v361_v19 = vld [vmem:[#allocation7 + $0x80] sm:$0xff] }
 0x102   : > { %v315_v33 = vsel %vm314_vm2, %v879_v23, %v880_v22  ;;  %v316_v34 = vsel %vm314_vm2, %v880_v22, %v879_v23  ;;  %v301_v35 = vsel %vm300_vm3, %v869_v25, %v870_v24  ;;  %v302_v36 = vsel %vm300_vm3, %v870_v24, %v869_v25 }
 0x103   : > { %v883_v39 = vpop.permute.xlu0 %882  ;;  %v366_v40 = vmul.f32 %v348_v21, %v301_v35  ;;  %v365_v41 = vmul.f32 %v347_v26, %v302_v36  ;;  %v370_v43 = vmul.f32 %v352_v28, %v315_v33  ;;  %v888_v44 = vpop.permute.xlu1 %887  ;;  %v369_v55 = vmul.f32 %v351_v38, %v316_v34 }
 0x104   : > { %v885_v46 = vunpack.i.h.bf16 %v883_v39  ;;  %v884_v47 = vunpack.i.l.bf16 %v883_v39  ;;  %v890_v48 = vunpack.i.h.bf16 %v888_v44  ;;  %v889_v49 = vunpack.i.l.bf16 %v888_v44 }
 0x105   : > { %v383_v52 = vpack.c.bf16 %v366_v40, %v364_v30  ;;  %v382_v53 = vpack.c.bf16 %v365_v41, %v363_v31  ;;  %v385_v61 = vpack.c.bf16 %v370_v43, %v368_v42  ;;  %v384_v1 = vpack.c.bf16 %v369_v55, %v367_v54  ;;  %v381_v31 = vld [vmem:[#allocation5] sm:$0xf] }
 0x106   : > { %v322_v56 = vsel %vm321_vm4, %v884_v47, %v885_v46  ;;  %v323_v57 = vsel %vm321_vm4, %v885_v46, %v884_v47  ;;  %v330_v58 = vsel %vm328_vm5, %v890_v48, %v889_v49  ;;  %v329_v0 = vsel %vm328_vm5, %v889_v49, %v890_v48 }
 0x107   : > { %403 = vmatprep.subr.bf16.mxu0 %v383_v52  ;;  %v893_v62 = vpop.permute.xlu0 %892  ;;  %v898_v63 = vpop.permute.xlu1 %897  ;;  %v374_v2 = vmul.f32 %v356_v50, %v323_v57  ;;  %v373_v3 = vmul.f32 %v355_v51, %v322_v56  ;;  %v376_v11 = vmul.f32 %v358_v60, %v330_v58  ;;  %v375_v22 = vmul.f32 %v357_v12, %v329_v0  ;;  %v513_v57 = vld [vmem:[#allocation8] sm:$0xff]  ;;  %v515_v60 = vld [vmem:[#allocation8 + $0x10] sm:$0xff] }
 0x108   : > { %404 = vmatpush1.bf16.msra.mxu0 %v382_v53  ;;  %v895_v4 = vunpack.i.h.bf16 %v893_v62  ;;  %v894_v5 = vunpack.i.l.bf16 %v893_v62  ;;  %v900_v7 = vunpack.i.h.bf16 %v898_v63  ;;  %v899_v8 = vunpack.i.l.bf16 %v898_v63  ;;  %v516_v62 = vld [vmem:[#allocation8 + $0x18] sm:$0xff]  ;;  %v517_v12 = vld [vmem:[#allocation8 + $0x20] sm:$0xff] }
 0x109   : > { %405 = vmatprep.subr.bf16.mxu0 %v385_v61  ;;  %v387_v10 = vpack.c.bf16 %v374_v2, %v372_v32  ;;  %v386_v21 = vpack.c.bf16 %v373_v3, %v371_v59  ;;  %v514_v61 = vld [vmem:[#allocation8 + $0x8] sm:$0xff] }
 0x10a   : > { %v336_v14 = vsel %vm335_vm6, %v894_v5, %v895_v4  ;;  %v337_v15 = vsel %vm335_vm6, %v895_v4, %v894_v5  ;;  %v344_v17 = vsel %vm342_vm7, %v900_v7, %v899_v8  ;;  %v343_v18 = vsel %vm342_vm7, %v899_v8, %v900_v7 }
 0x10b   : > { %v378_v20 = vmul.f32 %v360_v9, %v337_v15  ;;  %v377_v23 = vmul.f32 %v359_v13, %v336_v14  ;;  %v380_v24 = vmul.f32 %v362_v16, %v344_v17  ;;  %v379_v26 = vmul.f32 %v361_v19, %v343_v18  ;;  %v518_v13 = vld [vmem:[#allocation8 + $0x28] sm:$0xff]  ;;  %v519_v16 = vld [vmem:[#allocation8 + $0x30] sm:$0xff]  ;;  %v520_v17 = vld [vmem:[#allocation8 + $0x38] sm:$0xff] }
 0x10c   : > { %406 = vmatpush1.bf16.msra.mxu0 %v384_v1 }
 0x10d   : > { %407 = vmatprep.subr.bf16.mxu0 %v387_v10  ;;  %v389_v25 = vpack.c.bf16 %v378_v20, %v376_v11  ;;  %v388_v27 = vpack.c.bf16 %v377_v23, %v375_v22  ;;  %v391_v28 = vpack.c.bf16 %v380_v24, %v380_v24  ;;  %v390_v29 = vpack.c.bf16 %v379_v26, %v379_v26  ;;  %v522_v26 = vld [vmem:[#allocation8 + $0x48] sm:$0xff] }
 0x10f   : > { %v398_v30 = vsel %vm396_vm8, %v390_v29, 0  ;;  %v521_v29 = vld [vmem:[#allocation8 + $0x40] sm:$0xff] }
 0x110   : > { %408 = vmatpush1.bf16.msra.mxu0 %v386_v21 }
 0x111   : > { %409 = vmatprep.subr.bf16.mxu0 %v389_v25 }
 0x114   : > { %410 = vmatpush1.bf16.msra.mxu0 %v388_v27  ;;  %v523_v27 = vld [vmem:[#allocation8 + $0x50] sm:$0xff] }
 0x115   : > { %762 = vmatprep.subr.msk.bf16.mxu0 %vm396_vm8, %v391_v28  ;;  %v524_v28 = vld [vmem:[#allocation8 + $0x58] sm:$0xff] }
 0x118   : > { %412 = vmatpush1.bf16.msra.mxu0 %v398_v30 }
 0x11b   : > { %763 = vmatmul.mubr.msk.bf16.vlgmr.msra.gmra.mrb[0].mxu0 %vm392_vm9, %v381_v31 }
 0x1ee   : > { %v437_v32 = vpop.f32.mrb[0].mxu0 }
 0x1ef   : > { %v439_v33 = vpop.f32.mrb[1].mxu0  ;;  %v448_v34 = vmul.f32 %v437_v32, %v437_v32 }
 0x1f0   : > { %v441_v35 = vpop.f32.mrb[2].mxu0  ;;  %v444_v36 = vadd.f32 %v439_v33, %v437_v32  ;;  %v449_v37 = vmul.f32 %v439_v33, %v439_v33 }
 0x1f1   : > { %v442_v38 = vpop.f32.mrb[3].mxu0 }
 0x1f2   : > { %445 = vadd.xlane.f32.xlu0 %v444_v36  ;;  %v450_v39 = vadd.f32 %v449_v37, %v448_v34 }
 0x1f4   : > { %451 = vadd.xlane.f32.xlu1 %v450_v39 }
 0x27f   : > { %v446_v40 = vpop.xlane.xlu0 %445 }
 0x280   : > { %v447_v41 = vmul.f32 0.00390625, %v446_v40 }
 0x281   : > { %v452_v42 = vpop.xlane.xlu1 %451 }
 0x282   : > { %v453_v43 = vmul.f32 0.00390625, %v452_v42  ;;  %v454_v44 = vmul.f32 %v447_v41, %v447_v41  ;;  %v457_v48 = vsub.f32 %v437_v32, %v447_v41  ;;  %v458_v49 = vsub.f32 %v439_v33, %v447_v41 }
 0x284   : > { %v455_v45 = vsub.f32 %v453_v43, %v454_v44  ;;  %v525_v44 = vld [vmem:[#allocation8 + $0x60] sm:$0xff] }
 0x286   : > { %v456_v46 = vmax.f32 %v455_v45, 0.0  ;;  %v526_v45 = vld [vmem:[#allocation8 + $0x68] sm:$0xff] }
 0x288   : > { %v459_v47 = vadd.f32 1e-05, %v456_v46 }
 0x28a   : > { %901 = vrsqrt.f32 %v459_v47 }
 0x294   : > { %v902_v50 = vpop.eup %901 }
 0x295   : > { %v461_v51 = vmul.f32 %v902_v50, %v457_v48  ;;  %v462_v52 = vmul.f32 %v902_v50, %v458_v49  ;;  %v527_v48 = vld [vmem:[#allocation8 + $0x70] sm:$0xff]  ;;  %v528_v49 = vld [vmem:[#allocation8 + $0x78] sm:$0xff] }
 0x297   : > { %v1401_v53 = vmax.f32 %v461_v51, 0.0  ;;  %v1403_v54 = vmax.f32 %v462_v52, 0.0 }
 0x299   : > { %467 = vrot.lane.b32.xlu1 %v1403_v54, %s1102_s26  ;;  %465 = vrot.lane.b32.xlu0 %v1401_v53, %s1102_s26  ;;  %v540_v38 = vmul.f32 %v522_v26, %v1403_v54  ;;  %v539_v39 = vmul.f32 %v521_v29, %v1401_v53  ;;  %s1482_s26 = scalar_lea.hbm %s1531_s5, %s772_s10 }
 0x29d   : > { %473 = vrot.lane.b32.xlu1 %v1403_v54, %s1104_s11  ;;  %471 = vrot.lane.b32.xlu0 %v1401_v53, %s1104_s11  ;;  %s1110_s11 = smov [#allocation10]  }
 0x2a1   : > { %479 = vrot.lane.b32.xlu1 %v1403_v54, %s1101_s24  ;;  %477 = vrot.lane.b32.xlu0 %v1401_v53, %s1101_s24 }
 0x2a5   : > { %485 = vrot.lane.b32.xlu1 %v1403_v54, %s1103_s9  ;;  %483 = vrot.lane.b32.xlu0 %v1401_v53, %s1103_s9  ;;  %s634_s9 = scalar_lea.sflag [#allocation4], %s1324_s30 }
 0x2a9   : > { %491 = vrot.lane.b32.xlu1 %v1403_v54, %s1105_s12  ;;  %489 = vrot.lane.b32.xlu0 %v1401_v53, %s1105_s12  ;;  %s1023_s12 = sshll.u32 %s1110_s11, 4  ;;  %s1024_s12 = int_to_ptr.vmem [resolvable:$false] %s1023_s12 }
 0x2aa   : > { %p1026_p3 = scmp.lt.s32.totalorder %s1484_s17, %s1024_s12 }
 0x2ad   : > { %497 = vrot.lane.b32.xlu1 %v1403_v54, %s1106_s13  ;;  %495 = vrot.lane.b32.xlu0 %v1401_v53, %s1106_s13  ;;  %s1025_s13 = scalar_lea.vmem %s1024_s12, 512 }
 0x2ae   : > { %p1027_p7 = scmp.lt.s32.totalorder %s1025_s13, %s1019_s22 }
 0x2b0   : > { %p1028_p10 = por %p1027_p7, %p1026_p3 }
 0x2b1   : > { %503 = vrot.lane.b32.xlu1 %v1403_v54, %s1107_s7  ;;  %501 = vrot.lane.b32.xlu0 %v1401_v53, %s1107_s7 }
 0x2b2   : > { %p1029_p13 = pnand %p1028_p10, %p1022_p8 }
 0x2b5   : > { %509 = vrot.lane.b32.xlu1 %v1403_v54, %s1108_s8  ;;  %507 = vrot.lane.b32.xlu0 %v1401_v53, %s1108_s8 }
 0x30b   : > { %v468_v55 = vpop.permute.xlu1 %467  ;;  %v466_v56 = vpop.permute.xlu0 %465 }
 0x30c   : > { %v469_v58 = vsel %vm293_vm1, %v466_v56, %v468_v55  ;;  %v470_v59 = vsel %vm293_vm1, %v468_v55, %v466_v56 }
 0x30d   : > { %v531_v5 = vmul.f32 %v513_v57, %v470_v59  ;;  %v532_v8 = vmul.f32 %v514_v61, %v469_v58  ;;  %v529_v58 = vld [vmem:[#allocation8 + $0x80] sm:$0xff]  ;;  %v530_v59 = vld [vmem:[#allocation8 + $0x88] sm:$0xff] }
 0x30f   : > { %v474_v63 = vpop.permute.xlu1 %473  ;;  %v472_v2 = vpop.permute.xlu0 %471 }
 0x310   : > { %v475_v3 = vsel %vm300_vm3, %v472_v2, %v474_v63  ;;  %v476_v4 = vsel %vm300_vm3, %v474_v63, %v472_v2 }
 0x311   : > { %v533_v7 = vmul.f32 %v515_v60, %v476_v4  ;;  %v534_v9 = vmul.f32 %v516_v62, %v475_v3 }
 0x313   : > { %v480_v0 = vpop.permute.xlu1 %479  ;;  %v478_v1 = vpop.permute.xlu0 %477  ;;  %v551_v10 = vpack.c.bf16 %v534_v9, %v532_v8  ;;  %v550_v11 = vpack.c.bf16 %v533_v7, %v531_v5 }
 0x314   : > { %v481_v14 = vsel %vm307_vm0, %v478_v1, %v480_v0  ;;  %v482_v15 = vsel %vm307_vm0, %v480_v0, %v478_v1  ;;  %v549_v0 = vld [vmem:[%s1528_s2] sm:$0xf] }
 0x315   : > { %569 = vmatprep.subr.bf16.mxu1 %v551_v10  ;;  %v535_v22 = vmul.f32 %v517_v12, %v482_v15  ;;  %v536_v23 = vmul.f32 %v518_v13, %v481_v14 }
 0x316   : > { %570 = vmatpush1.bf16.msra.mxu1 %v550_v11 }
 0x317   : > { %v486_v18 = vpop.permute.xlu1 %485  ;;  %v484_v19 = vpop.permute.xlu0 %483 }
 0x318   : > { %v487_v20 = vsel %vm314_vm2, %v484_v19, %v486_v18  ;;  %v488_v21 = vsel %vm314_vm2, %v486_v18, %v484_v19 }
 0x319   : > { %v537_v24 = vmul.f32 %v519_v16, %v488_v21  ;;  %v538_v25 = vmul.f32 %v520_v17, %v487_v20 }
 0x31b   : > { %v492_v30 = vpop.permute.xlu1 %491  ;;  %v490_v31 = vpop.permute.xlu0 %489  ;;  %v553_v32 = vpack.c.bf16 %v538_v25, %v536_v23  ;;  %v552_v33 = vpack.c.bf16 %v537_v24, %v535_v22 }
 0x31c   : > { %v493_v34 = vsel %vm321_vm4, %v490_v31, %v492_v30  ;;  %v494_v35 = vsel %vm321_vm4, %v492_v30, %v490_v31 }
 0x31d   : > { %v541_v36 = vmul.f32 %v523_v27, %v493_v34  ;;  %v542_v37 = vmul.f32 %v524_v28, %v494_v35  ;;  %571 = vmatprep.subr.bf16.mxu1 %v553_v32 }
 0x31e   : > { %572 = vmatpush1.bf16.msra.mxu1 %v552_v33 }
 0x31f   : > { %v498_v40 = vpop.permute.xlu1 %497  ;;  %v496_v41 = vpop.permute.xlu0 %495  ;;  %v555_v42 = vpack.c.bf16 %v542_v37, %v540_v38  ;;  %v554_v43 = vpack.c.bf16 %v541_v36, %v539_v39 }
 0x320   : > { %v499_v46 = vsel %vm328_vm5, %v496_v41, %v498_v40  ;;  %v500_v47 = vsel %vm328_vm5, %v498_v40, %v496_v41 }
 0x321   : > { %573 = vmatprep.subr.bf16.mxu1 %v555_v42  ;;  %v543_v54 = vmul.f32 %v525_v44, %v499_v46  ;;  %v544_v55 = vmul.f32 %v526_v45, %v500_v47 }
 0x322   : > { %574 = vmatpush1.bf16.msra.mxu1 %v554_v43 }
 0x323   : > { %v504_v50 = vpop.permute.xlu1 %503  ;;  %v502_v51 = vpop.permute.xlu0 %501 }
 0x324   : > { %v505_v52 = vsel %vm335_vm6, %v502_v51, %v504_v50  ;;  %v506_v53 = vsel %vm335_vm6, %v504_v50, %v502_v51 }
 0x325   : > { %v545_v56 = vmul.f32 %v527_v48, %v505_v52  ;;  %v546_v57 = vmul.f32 %v528_v49, %v506_v53 }
 0x327   : > { %v510_v60 = vpop.permute.xlu1 %509  ;;  %v508_v61 = vpop.permute.xlu0 %507  ;;  %v557_v62 = vpack.c.bf16 %v546_v57, %v544_v55  ;;  %v556_v63 = vpack.c.bf16 %v545_v56, %v543_v54 }
 0x328   : > { %v511_v2 = vsel %vm342_vm7, %v508_v61, %v510_v60  ;;  %v512_v3 = vsel %vm342_vm7, %v510_v60, %v508_v61 }
 0x329   : > { %v547_v4 = vmul.f32 %v529_v58, %v511_v2  ;;  %v548_v5 = vmul.f32 %v530_v59, %v512_v3  ;;  %575 = vmatprep.subr.bf16.mxu1 %v557_v62 }
 0x32a   : > { %576 = vmatpush1.bf16.msra.mxu1 %v556_v63 }
 0x32b   : > { %v558_v7 = vpack.c.bf16 %v547_v4, %v547_v4  ;;  %v559_v8 = vpack.c.bf16 %v548_v5, %v548_v5 }
 0x32d   : > { %764 = vmatprep.subr.msk.bf16.mxu1 %vm396_vm8, %v559_v8  ;;  %v564_v9 = vsel %vm396_vm8, %v558_v7, 0 }
 0x32e   : > { %578 = vmatpush1.bf16.msra.mxu1 %v564_v9 }
 0x331   : > { %765 = vmatmul.mubr.msk.bf16.vlgmr.msra.gmra.mrb[0].mxu1 %vm392_vm9, %v549_v0 }
 0x404   : > { %v603_v1 = vpop.f32.mrb[0].mxu1 }
 0x405   : > { %v605_v6 = vpop.f32.mrb[1].mxu1  ;;  %v614_v10 = vmul.f32 %v603_v1, %v603_v1 }
 0x406   : > { %v607_v11 = vpop.f32.mrb[2].mxu1  ;;  %v610_v12 = vadd.f32 %v605_v6, %v603_v1  ;;  %v615_v13 = vmul.f32 %v605_v6, %v605_v6 }
 0x407   : > { %v608_v14 = vpop.f32.mrb[3].mxu1 }
 0x408   : > { %611 = vadd.xlane.f32.xlu0 %v610_v12  ;;  %v616_v15 = vadd.f32 %v615_v13, %v614_v10 }
 0x40a   : > { %617 = vadd.xlane.f32.xlu1 %v616_v15 }
 0x495   : > { %v612_v16 = vpop.xlane.xlu0 %611 }
 0x496   : > { %v613_v17 = vmul.f32 0.00390625, %v612_v16 }
 0x497   : > { %v618_v18 = vpop.xlane.xlu1 %617 }
 0x498   : > { %v619_v19 = vmul.f32 0.00390625, %v618_v18  ;;  %v620_v20 = vmul.f32 %v613_v17, %v613_v17  ;;  %v623_v24 = vsub.f32 %v603_v1, %v613_v17  ;;  %v624_v25 = vsub.f32 %v605_v6, %v613_v17 }
 0x49a   : > { %v621_v21 = vsub.f32 %v619_v19, %v620_v20 }
 0x49c   : > { %v622_v22 = vmax.f32 %v621_v21, 0.0 }
 0x49e   : > { %v625_v23 = vadd.f32 1e-05, %v622_v22 }
 0x4a0   : > { %903 = vrsqrt.f32 %v625_v23 }
 0x4aa   : > { %v904_v26 = vpop.eup %903 }
 0x4ab   : > { %v627_v27 = vmul.f32 %v904_v26, %v623_v24  ;;  %v628_v28 = vmul.f32 %v904_v26, %v624_v25 }
 0x4ad   : > { %v629_v29 = vmax.f32 %v627_v27, 0.0  ;;  %v630_v30 = vmax.f32 %v628_v28, 0.0 }
 0x4af   : > { %631 = vst [vmem:[%s282_s28] sm:$0xff] %v629_v29  ;;  %632 = vst [vmem:[%s282_s28 + $0x8] sm:$0xff] %v630_v30 }
 0x4b0   : > { %1032 = shalt.err (!%p1029_p13)
}
 0x4b1   : > { %s1033_s30 = scalar_lea.hbm %s1482_s26, 256  ;;  %s1037_s29 = scalar_lea.hbm %s1531_s5, 512 }
 0x4b2   : > { %p1034_p5 = scmp.ne.s32.totalorder %s1482_s26, %s1033_s30  ;;  %p1038_p11 = scmp.lt.u32.totalorder %s1482_s26, %s1531_s5 }
 0x4b3   : > { %p1039_p12 = scmp.lt.u32.totalorder %s1037_s29, %s1033_s30  ;;  %p1041_p1 = scmp.lt.u32.totalorder %s1033_s30, %s1482_s26 }
 0x4b4   : > { %p1035_p0 = pnand %p1034_p5, %p1279_p6 }
 0x4b5   : > { %p1040_p2 = por %p1039_p12, %p1038_p11 }
 0x4b6   : > { %p1036_p9 = pneg %p1035_p0 }
 0x4b7   : > { %p1042_p4 = por %p1041_p1, %p1040_p2 }
 0x4b9   : > { %p1043_p8 = pnand %p1042_p4, %p1036_p9 }
 0x4bb   : > { %1046 = shalt.err (!%p1043_p8)
}
 0x4bc   : > { %787 = dma.vmem_to_hbm [thread:$0]  (%p1279_p6), %s1484_s17, 256, %s1482_s26, %s634_s9  }
 0x4bd PF: > { %s660_s10 = sand.u32 1, %s1081_s18   ;;  %p1549_p3 = scmp.ne.s32.totalorder %s1536_s25, 0 }
 0x4be   : > { %p1550_p7 = scmp.ge.s32.totalorder %s1093_s21, 2  ;;  %s661_s28 = scalar_lea.sflag [#allocation4], %s660_s10 }
 0x4c0   : > { %p804_p10 = pnand %p1550_p7, %p1549_p3 }
 0x4c2   : > { %1076 = dma.done.wait (!%p804_p10), %s661_s28, 256  }
 0x4c3   : > { %1078 = vsyncadd (!%p804_p10), %s661_s28, 4294967040  ;;  %p20_p13 = scmp.ge.s32.totalorder %s1265_s14, 4   ;;  %s1551_s18 = smov %s1085_s19 }
 0x4c4   : > { %s1552_s19 = smov %s1089_s20  ;;  %s1553_s20 = smov %s1275_s23 }
 0x4c5   : > { %s1554_s21 = smov %s1265_s14  ;;  %22 = sbr.rel (!%p20_p13) target bundleno = 7 (0x7), region = 97 }
 0x4cc   :  { %666 = vsyncpa [#allocation3], 1 }
 0x4cd   :  { %668 = vsyncpa [#allocation3 + $0x1], 1 }
 0x4ce   :  { %669 = vsyncpa [#allocation6], 1 }
 0x4cf   :  { %670 = vsyncpa [#allocation9], 1 }
 0x4d0   :  { %671 = vsyncpa [#allocation4], 1 }
 0x4d1   :  { %673 = vsyncpa [#allocation4 + $0x1], 1 }

</bundles_post_ra>
